<compile_context>
chip_gen: v7x
topology: tpu7x:2x2x1
jax: 0.10.0
libtpu: 0.0.40
codegen_flags: <defaults>
</compile_context>

<pallas_src>
import math
from functools import partial

import jax
import jax.numpy as jnp
from jax.experimental import pallas as pl
from jax.experimental.pallas import tpu as pltpu

# ---- model config (ModelConfig equivalent, small shapes) --------------------
INPUT_DIM = 32
HIDDEN_DIM = 32
N_HEADS = 4                # only touches the (dead) q/k score path; folded out
OUTPUT_DIM = 2
LN_EPS = 1e-5

V_SLAB_ROWS = 16           # b0,g0,be0,b1,g1,be1,b_fold,(unused),bc2[0],bc2[1],...
TB_MAX = 2048              # max batch tile (2048,32) bf16 = 128 KiB; tiny vs VMEM
SPLIT_THRESHOLD = 256      # padded batch >= this -> >=2 grid steps, 128-mult tiles

assert INPUT_DIM == HIDDEN_DIM, "weight slab packing assumes input_dim == hidden_dim"


# ----------------------------- kernel ----------------------------------------
def jamba_kernel(x_ref, w_ref, v_ref, out_ref):
    def vec(r):                                # (1, H) f32 row of the bias slab
        return v_ref[r:r + 1, :]

    def matmul(a, i):                          # bf16 operands, f32 MXU accumulation
        return jnp.dot(a.astype(jnp.bfloat16), w_ref[i],
                       preferred_element_type=jnp.float32)

    def layer_norm(h, g, b):                   # one-pass variance: E[h^2] - mu^2
        mu = jnp.mean(h, axis=-1, keepdims=True)
        var = jnp.mean(h * h, axis=-1, keepdims=True) - mu * mu
        return (h - mu) * jax.lax.rsqrt(var + LN_EPS) * g + b

    x = x_ref[...]                             # (TB, INPUT_DIM) bf16 (host-cast)

    # feature extractor: [Linear -> LayerNorm -> ReLU -> Dropout(id)] x 2
    h = jnp.maximum(layer_norm(matmul(x, 0) + vec(0), vec(1), vec(2)), 0.0)
    h = jnp.maximum(layer_norm(matmul(h, 1) + vec(3), vec(4), vec(5)), 0.0)

    # length-1 MultiheadAttention (softmax == 1) + classifier Linear 1,
    # pre-folded on the host into a single matmul: W_fold = Wv @ Wo @ Wc1.
    c = jnp.maximum(matmul(h, 2) + vec(6), 0.0)          # (TB, H); cols H//2: exact 0

    # classifier Linear 2, computed TRANSPOSED so the lane axis is the batch
    # (lane-dense output): logits_T = Wc2^T @ c^T via dot_general contracting
    # the H axis of both operands. w_ref[3] holds Wc2^T zero-padded to (H, H).
    logits_t = jax.lax.dot_general(
        w_ref[3], c.astype(jnp.bfloat16),
        dimension_numbers=(((1,), (1,)), ((), ())),
        preferred_element_type=jnp.float32)              # (H, TB)

    bc2_col = v_ref[8:8 + OUTPUT_DIM, 0:1]               # (OUTPUT_DIM, 1) f32
    out = logits_t[0:OUTPUT_DIM, :] + bc2_col            # (OUTPUT_DIM, TB)
    out_ref[...] = out.astype(out_ref.dtype)


# ------------------------- params: init / fold / pack ------------------------
def init_raw_params(key):
    """PyTorch-Linear-style init; weights stored as (fan_in, fan_out)."""
    def lin(k, fan_in, fan_out):
        bound = 1.0 / math.sqrt(fan_in)
        kw, kb = jax.random.split(k)
        w = jax.random.uniform(kw, (fan_in, fan_out), jnp.float32, -bound, bound)
        b = jax.random.uniform(kb, (1, fan_out), jnp.float32, -bound, bound)
        return w, b

    ks = jax.random.split(key, 8)
    p = {}
    p["w0"], p["b0"] = lin(ks[0], INPUT_DIM, HIDDEN_DIM)
    p["g0"], p["be0"] = jnp.ones((1, HIDDEN_DIM), jnp.float32), jnp.zeros((1, HIDDEN_DIM), jnp.float32)
    p["w1"], p["b1"] = lin(ks[1], HIDDEN_DIM, HIDDEN_DIM)
    p["g1"], p["be1"] = jnp.ones((1, HIDDEN_DIM), jnp.float32), jnp.zeros((1, HIDDEN_DIM), jnp.float32)
    p["wq"], p["bq"] = lin(ks[2], HIDDEN_DIM, HIDDEN_DIM)   # dead (len-1 softmax == 1)
    p["wk"], p["bk"] = lin(ks[3], HIDDEN_DIM, HIDDEN_DIM)   # dead (len-1 softmax == 1)
    p["wv"], p["bv"] = lin(ks[4], HIDDEN_DIM, HIDDEN_DIM)
    p["wo"], p["bo"] = lin(ks[5], HIDDEN_DIM, HIDDEN_DIM)
    p["wc1"], p["bc1"] = lin(ks[6], HIDDEN_DIM, HIDDEN_DIM // 2)
    p["wc2"], p["bc2"] = lin(ks[7], HIDDEN_DIM // 2, OUTPUT_DIM)
    return p


def pack_params(p):
    """Fold Wv->Wo->Wc1 and pack everything into two DMA slabs."""
    H, Hh = HIDDEN_DIM, HIDDEN_DIM // 2

    w_fold = p["wv"] @ p["wo"] @ p["wc1"]                           # (H, H//2)
    b_fold = (p["bv"] @ p["wo"] + p["bo"]) @ p["wc1"] + p["bc1"]    # (1, H//2)

    # weight slab: (4, H, H) bf16, leading-axis indexed (tile-aligned blocks)
    w_slab = jnp.zeros((4, H, H), jnp.float32)
    w_slab = w_slab.at[0].set(p["w0"])
    w_slab = w_slab.at[1].set(p["w1"])
    w_slab = w_slab.at[2, :, :Hh].set(w_fold)                       # cols Hh.. stay 0
    w_slab = w_slab.at[3, :OUTPUT_DIM, :Hh].set(p["wc2"].T)         # Wc2^T (transposed out)
    w_slab = w_slab.astype(jnp.bfloat16)        # halve weight DMA, 2x MXU rate

    # bias / LN slab: (16, H) f32
    v_slab = jnp.zeros((V_SLAB_ROWS, H), jnp.float32)
    v_slab = v_slab.at[0, :].set(p["b0"][0])
    v_slab = v_slab.at[1, :].set(p["g0"][0])
    v_slab = v_slab.at[2, :].set(p["be0"][0])
    v_slab = v_slab.at[3, :].set(p["b1"][0])
    v_slab = v_slab.at[4, :].set(p["g1"][0])
    v_slab = v_slab.at[5, :].set(p["be1"][0])
    v_slab = v_slab.at[6, :Hh].set(b_fold[0])   # padded cols -> relu(0) = 0
    v_slab = v_slab.at[8:8 + OUTPUT_DIM, 0].set(p["bc2"][0])        # bc2 as a column
    return w_slab, v_slab


# ------------------------------ wrapper ---------------------------------------
@partial(jax.jit, static_argnames=("tb_max",))
def jamba_forward(x, w_slab, v_slab, tb_max=TB_MAX):
    batch = x.shape[0]
    x = x.astype(jnp.bfloat16)                  # host cast: x only feeds the MXU

    b16 = 16 * pl.cdiv(batch, 16)               # bf16 sublane-tile alignment
    if b16 < SPLIT_THRESHOLD:
        tb = b16                                # single grid step, tile == full batch
    else:
        # aim for >=2 "parallel" steps (v7x 2-TC sharding) with 128-multiple
        # tiles (keeps the lane-dense transposed output BlockSpec legal)
        tb = min(tb_max, 128 * pl.cdiv(pl.cdiv(b16, 2), 128))
    b_pad = tb * pl.cdiv(b16, tb)               # no rows silently dropped
    if b_pad != batch:
        x = jnp.pad(x, ((0, b_pad - batch), (0, 0)))

    out_t = pl.pallas_call(
        jamba_kernel,
        out_shape=jax.ShapeDtypeStruct((OUTPUT_DIM, b_pad), jnp.float32),
        grid_spec=pltpu.PrefetchScalarGridSpec(
            num_scalar_prefetch=0,
            grid=(b_pad // tb,),
            in_specs=[
                pl.BlockSpec((tb, INPUT_DIM), lambda i: (i, 0)),
                # parameter slabs: constant index_map -> grid-invariant, VMEM-resident
                pl.BlockSpec((4, HIDDEN_DIM, HIDDEN_DIM), lambda i: (0, 0, 0)),
                pl.BlockSpec((V_SLAB_ROWS, HIDDEN_DIM), lambda i: (0, 0)),
            ],
            # lane-dense output: lane axis == batch
            out_specs=pl.BlockSpec((OUTPUT_DIM, tb), lambda i: (0, i)),
        ),
        compiler_params=pltpu.CompilerParams(
            dimension_semantics=("parallel",),
            vmem_limit_bytes=32 * 1024 * 1024),
    )(x, w_slab, v_slab)
    return out_t[:, :batch].T                   # (batch, OUTPUT_DIM)


# ----------------------------- references -------------------------------------
def reference_packed(x, w_slab, v_slab):
    """jnp mirror of the kernel math (same folding, packing, bf16 operand casts)."""
    def matmul(a, i):
        return jnp.dot(a.astype(jnp.bfloat16), w_slab[i],
                       preferred_element_type=jnp.float32)

    def layer_norm(h, g, b):
        mu = jnp.mean(h, axis=-1, keepdims=True)
        var = jnp.mean(h * h, axis=-1, keepdims=True) - mu * mu
        return (h - mu) * jax.lax.rsqrt(var + LN_EPS) * g + b

    v = v_slab
    xb = x.astype(jnp.bfloat16)
    h = jnp.maximum(layer_norm(matmul(xb, 0) + v[0:1], v[1:2], v[2:3]), 0.0)
    h = jnp.maximum(layer_norm(matmul(h, 1) + v[3:4], v[4:5], v[5:6]), 0.0)
    c = jnp.maximum(matmul(h, 2) + v[6:7], 0.0)
    logits_t = jax.lax.dot_general(
        w_slab[3], c.astype(jnp.bfloat16),
        dimension_numbers=(((1,), (1,)), ((), ())),
        preferred_element_type=jnp.float32)
    return (logits_t[0:OUTPUT_DIM, :] + v[8:8 + OUTPUT_DIM, 0:1]).T


def reference_module_f32(x, p):
    """Faithful f32 JambaThreatModel.forward (eval mode); the len-1 attention
    softmax weight is exactly 1, so attended = out_proj(v_proj(features))."""
    def ln(h, g, b):
        mu = jnp.mean(h, -1, keepdims=True)
        var = jnp.mean((h - mu) ** 2, -1, keepdims=True)
        return (h - mu) / jnp.sqrt(var + LN_EPS) * g + b

    h = jnp.maximum(ln(x @ p["w0"] + p["b0"], p["g0"], p["be0"]), 0.0)
    h = jnp.maximum(ln(h @ p["w1"] + p["b1"], p["g1"], p["be1"]), 0.0)
    v = h @ p["wv"] + p["bv"]
    attn = v @ p["wo"] + p["bo"]
    c = jnp.maximum(attn @ p["wc1"] + p["bc1"], 0.0)
    return c @ p["wc2"] + p["bc2"]


# -------------------------------- main -----------------------------------------
if __name__ == "__main__":
    key = jax.random.PRNGKey(0)
    kx, kp = jax.random.split(key)
    raw_params = init_raw_params(kp)
    w_slab, v_slab = pack_params(raw_params)

    # batch=12: pad-to-16, single-tile path.  batch=300: 128-aligned 2-step grid.
    for batch in (12, 300):
        x = jax.random.normal(jax.random.fold_in(kx, batch), (batch, INPUT_DIM),
                              jnp.float32)
        out = jax.block_until_ready(jamba_forward(x, w_slab, v_slab))
        assert out.shape == (batch, OUTPUT_DIM)

        # 1) tight check vs a jnp mirror of the packed / folded / bf16 kernel math
        ref_packed = reference_packed(x, w_slab, v_slab)
        assert bool(jnp.allclose(out, ref_packed, atol=5e-3, rtol=5e-3)), \
            f"batch={batch}: mismatch vs packed/bf16 reference"

        # 2) semantic check vs the faithful f32 module forward (bf16 matmul
        #    operands -> slightly looser tolerance)
        ref_f32 = reference_module_f32(x, raw_params)
        assert bool(jnp.allclose(out, ref_f32, atol=5e-2, rtol=5e-2)), \
            f"batch={batch}: mismatch vs f32 module reference"

    print("KERNEL_OK")
</pallas_src>

<mosaic_0001>
module attributes {stable_mosaic.version = 11 : i64} {
  func.func @jamba_kernel(%arg0: i32, %arg1: memref<16x32xbf16, #tpu.memory_space<vmem>>, %arg2: memref<4x32x32xbf16, #tpu.memory_space<vmem>>, %arg3: memref<16x32xf32, #tpu.memory_space<vmem>>, %arg4: memref<2x16xf32, #tpu.memory_space<vmem>>) attributes {dimension_semantics = [#tpu.dimension_semantics<parallel>], iteration_bounds = array<i64: 1>, scalar_prefetch = 0 : i64, scratch_operands = 0 : i64, tpu.core_type = #tpu.core_type<tc>, window_params = [{transform_indices = @transform_0, window_bounds = array<i64: 16, 32>}, {pipeline_mode = #tpu.pipeline_mode<synchronous>, transform_indices = @transform_1, window_bounds = array<i64: 4, 32, 32>}, {pipeline_mode = #tpu.pipeline_mode<synchronous>, transform_indices = @transform_2, window_bounds = array<i64: 16, 32>}, {transform_indices = @transform_3, window_bounds = array<i64: 2, 16>}]} {
    %c0 = arith.constant 0 : index
    %c0_0 = arith.constant 0 : index
    %0 = vector.load %arg1[%c0, %c0_0] : memref<16x32xbf16, #tpu.memory_space<vmem>>, vector<16x32xbf16>
    %c0_1 = arith.constant 0 : index
    %c0_2 = arith.constant 0 : index
    %c0_3 = arith.constant 0 : index
    %1 = vector.load %arg2[%c0_1, %c0_2, %c0_3] : memref<4x32x32xbf16, #tpu.memory_space<vmem>>, vector<1x32x32xbf16>
    %2 = vector.shape_cast %1 : vector<1x32x32xbf16> to vector<32x32xbf16>
    %cst = arith.constant dense<0.000000e+00> : vector<16x32xf32>
    %3 = tpu.matmul %0, %2, %cst {dimension_numbers = #tpu.dot_dimension_numbers<[1], [0], [0], [1], [0, 0, 1, 1], [], []>} : vector<16x32xbf16>, vector<32x32xbf16>, vector<16x32xf32> -> vector<16x32xf32>
    %c0_4 = arith.constant 0 : index
    %c0_5 = arith.constant 0 : index
    %4 = vector.load %arg3[%c0_4, %c0_5] : memref<16x32xf32, #tpu.memory_space<vmem>>, vector<1x32xf32>
    %5 = vector.broadcast %4 : vector<1x32xf32> to vector<16x32xf32>
    %6 = arith.addf %3, %5 : vector<16x32xf32>
    %c1 = arith.constant 1 : index
    %c0_6 = arith.constant 0 : index
    %7 = vector.load %arg3[%c1, %c0_6] : memref<16x32xf32, #tpu.memory_space<vmem>>, vector<1x32xf32>
    %c2 = arith.constant 2 : index
    %c0_7 = arith.constant 0 : index
    %8 = vector.load %arg3[%c2, %c0_7] : memref<16x32xf32, #tpu.memory_space<vmem>>, vector<1x32xf32>
    %cst_8 = arith.constant dense<0.000000e+00> : vector<16xf32>
    %9 = vector.multi_reduction <add>, %6, %cst_8 [1] : vector<16x32xf32> to vector<16xf32>
    %10 = vector.shape_cast %9 : vector<16xf32> to vector<16x1xf32>
    %cst_9 = arith.constant 3.200000e+01 : f32
    %11 = vector.broadcast %cst_9 : f32 to vector<16x1xf32>
    %12 = arith.divf %10, %11 : vector<16x1xf32>
    %13 = arith.mulf %6, %6 : vector<16x32xf32>
    %cst_10 = arith.constant dense<0.000000e+00> : vector<16xf32>
    %14 = vector.multi_reduction <add>, %13, %cst_10 [1] : vector<16x32xf32> to vector<16xf32>
    %15 = vector.shape_cast %14 : vector<16xf32> to vector<16x1xf32>
    %cst_11 = arith.constant 3.200000e+01 : f32
    %16 = vector.broadcast %cst_11 : f32 to vector<16x1xf32>
    %17 = arith.divf %15, %16 : vector<16x1xf32>
    %18 = arith.mulf %12, %12 : vector<16x1xf32>
    %19 = arith.subf %17, %18 : vector<16x1xf32>
    %20 = vector.broadcast %12 : vector<16x1xf32> to vector<16x32xf32>
    %21 = arith.subf %6, %20 : vector<16x32xf32>
    %cst_12 = arith.constant 9.99999974E-6 : f32
    %22 = vector.broadcast %cst_12 : f32 to vector<16x1xf32>
    %23 = arith.addf %19, %22 : vector<16x1xf32>
    %24 = math.rsqrt %23 : vector<16x1xf32>
    %25 = vector.broadcast %24 : vector<16x1xf32> to vector<16x32xf32>
    %26 = arith.mulf %21, %25 : vector<16x32xf32>
    %27 = vector.broadcast %7 : vector<1x32xf32> to vector<16x32xf32>
    %28 = arith.mulf %26, %27 : vector<16x32xf32>
    %29 = vector.broadcast %8 : vector<1x32xf32> to vector<16x32xf32>
    %30 = arith.addf %28, %29 : vector<16x32xf32>
    %cst_13 = arith.constant 0.000000e+00 : f32
    %31 = vector.broadcast %cst_13 : f32 to vector<16x32xf32>
    %32 = arith.maximumf %30, %31 : vector<16x32xf32>
    %33 = arith.truncf %32 : vector<16x32xf32> to vector<16x32xbf16>
    %c1_14 = arith.constant 1 : index
    %c0_15 = arith.constant 0 : index
    %c0_16 = arith.constant 0 : index
    %34 = vector.load %arg2[%c1_14, %c0_15, %c0_16] : memref<4x32x32xbf16, #tpu.memory_space<vmem>>, vector<1x32x32xbf16>
    %35 = vector.shape_cast %34 : vector<1x32x32xbf16> to vector<32x32xbf16>
    %cst_17 = arith.constant dense<0.000000e+00> : vector<16x32xf32>
    %36 = tpu.matmul %33, %35, %cst_17 {dimension_numbers = #tpu.dot_dimension_numbers<[1], [0], [0], [1], [0, 0, 1, 1], [], []>} : vector<16x32xbf16>, vector<32x32xbf16>, vector<16x32xf32> -> vector<16x32xf32>
    %c3 = arith.constant 3 : index
    %c0_18 = arith.constant 0 : index
    %37 = vector.load %arg3[%c3, %c0_18] : memref<16x32xf32, #tpu.memory_space<vmem>>, vector<1x32xf32>
    %38 = vector.broadcast %37 : vector<1x32xf32> to vector<16x32xf32>
    %39 = arith.addf %36, %38 : vector<16x32xf32>
    %c4 = arith.constant 4 : index
    %c0_19 = arith.constant 0 : index
    %40 = vector.load %arg3[%c4, %c0_19] : memref<16x32xf32, #tpu.memory_space<vmem>>, vector<1x32xf32>
    %c5 = arith.constant 5 : index
    %c0_20 = arith.constant 0 : index
    %41 = vector.load %arg3[%c5, %c0_20] : memref<16x32xf32, #tpu.memory_space<vmem>>, vector<1x32xf32>
    %cst_21 = arith.constant dense<0.000000e+00> : vector<16xf32>
    %42 = vector.multi_reduction <add>, %39, %cst_21 [1] : vector<16x32xf32> to vector<16xf32>
    %43 = vector.shape_cast %42 : vector<16xf32> to vector<16x1xf32>
    %cst_22 = arith.constant 3.200000e+01 : f32
    %44 = vector.broadcast %cst_22 : f32 to vector<16x1xf32>
    %45 = arith.divf %43, %44 : vector<16x1xf32>
    %46 = arith.mulf %39, %39 : vector<16x32xf32>
    %cst_23 = arith.constant dense<0.000000e+00> : vector<16xf32>
    %47 = vector.multi_reduction <add>, %46, %cst_23 [1] : vector<16x32xf32> to vector<16xf32>
    %48 = vector.shape_cast %47 : vector<16xf32> to vector<16x1xf32>
    %cst_24 = arith.constant 3.200000e+01 : f32
    %49 = vector.broadcast %cst_24 : f32 to vector<16x1xf32>
    %50 = arith.divf %48, %49 : vector<16x1xf32>
    %51 = arith.mulf %45, %45 : vector<16x1xf32>
    %52 = arith.subf %50, %51 : vector<16x1xf32>
    %53 = vector.broadcast %45 : vector<16x1xf32> to vector<16x32xf32>
    %54 = arith.subf %39, %53 : vector<16x32xf32>
    %cst_25 = arith.constant 9.99999974E-6 : f32
    %55 = vector.broadcast %cst_25 : f32 to vector<16x1xf32>
    %56 = arith.addf %52, %55 : vector<16x1xf32>
    %57 = math.rsqrt %56 : vector<16x1xf32>
    %58 = vector.broadcast %57 : vector<16x1xf32> to vector<16x32xf32>
    %59 = arith.mulf %54, %58 : vector<16x32xf32>
    %60 = vector.broadcast %40 : vector<1x32xf32> to vector<16x32xf32>
    %61 = arith.mulf %59, %60 : vector<16x32xf32>
    %62 = vector.broadcast %41 : vector<1x32xf32> to vector<16x32xf32>
    %63 = arith.addf %61, %62 : vector<16x32xf32>
    %cst_26 = arith.constant 0.000000e+00 : f32
    %64 = vector.broadcast %cst_26 : f32 to vector<16x32xf32>
    %65 = arith.maximumf %63, %64 : vector<16x32xf32>
    %66 = arith.truncf %65 : vector<16x32xf32> to vector<16x32xbf16>
    %c2_27 = arith.constant 2 : index
    %c0_28 = arith.constant 0 : index
    %c0_29 = arith.constant 0 : index
    %67 = vector.load %arg2[%c2_27, %c0_28, %c0_29] : memref<4x32x32xbf16, #tpu.memory_space<vmem>>, vector<1x32x32xbf16>
    %68 = vector.shape_cast %67 : vector<1x32x32xbf16> to vector<32x32xbf16>
    %cst_30 = arith.constant dense<0.000000e+00> : vector<16x32xf32>
    %69 = tpu.matmul %66, %68, %cst_30 {dimension_numbers = #tpu.dot_dimension_numbers<[1], [0], [0], [1], [0, 0, 1, 1], [], []>} : vector<16x32xbf16>, vector<32x32xbf16>, vector<16x32xf32> -> vector<16x32xf32>
    %c6 = arith.constant 6 : index
    %c0_31 = arith.constant 0 : index
    %70 = vector.load %arg3[%c6, %c0_31] : memref<16x32xf32, #tpu.memory_space<vmem>>, vector<1x32xf32>
    %71 = vector.broadcast %70 : vector<1x32xf32> to vector<16x32xf32>
    %72 = arith.addf %69, %71 : vector<16x32xf32>
    %cst_32 = arith.constant 0.000000e+00 : f32
    %73 = vector.broadcast %cst_32 : f32 to vector<16x32xf32>
    %74 = arith.maximumf %72, %73 : vector<16x32xf32>
    %c3_33 = arith.constant 3 : index
    %c0_34 = arith.constant 0 : index
    %c0_35 = arith.constant 0 : index
    %75 = vector.load %arg2[%c3_33, %c0_34, %c0_35] : memref<4x32x32xbf16, #tpu.memory_space<vmem>>, vector<1x32x32xbf16>
    %76 = vector.shape_cast %75 : vector<1x32x32xbf16> to vector<32x32xbf16>
    %77 = arith.truncf %74 : vector<16x32xf32> to vector<16x32xbf16>
    %cst_36 = arith.constant dense<0.000000e+00> : vector<32x16xf32>
    %78 = tpu.matmul %76, %77, %cst_36 {dimension_numbers = #tpu.dot_dimension_numbers<[1], [1], [0], [0], [0, 0, 1, 0], [], []>} : vector<32x32xbf16>, vector<16x32xbf16>, vector<32x16xf32> -> vector<32x16xf32>
    %c8 = arith.constant 8 : index
    %c0_37 = arith.constant 0 : index
    %79 = vector.load %arg3[%c8, %c0_37] : memref<16x32xf32, #tpu.memory_space<vmem>>, vector<2x1xf32>
    %80 = vector.extract_strided_slice %78 {offsets = [0, 0], sizes = [2, 16], strides = [1, 1]} : vector<32x16xf32> to vector<2x16xf32>
    %81 = vector.broadcast %79 : vector<2x1xf32> to vector<2x16xf32>
    %82 = arith.addf %80, %81 : vector<2x16xf32>
    %c0_38 = arith.constant 0 : index
    %c0_39 = arith.constant 0 : index
    %83 = vector.load %arg4[%c0_38, %c0_39] : memref<2x16xf32, #tpu.memory_space<vmem>>, vector<2x16xf32>
    tpu.vector_store %arg4[%c0_38, %c0_39], %82 {strides = array<i32>} : memref<2x16xf32, #tpu.memory_space<vmem>>, vector<2x16xf32>,
    return
  }
  func.func @transform_0(%arg0: i32) -> (i32, i32) {
    %c0_i32 = arith.constant 0 : i32
    %c0_i32_0 = arith.constant 0 : i32
    return %arg0, %c0_i32 : i32, i32
  }
  func.func @transform_1(%arg0: i32) -> (i32, i32, i32) {
    %c0_i32 = arith.constant 0 : i32
    %c0_i32_0 = arith.constant 0 : i32
    %c0_i32_1 = arith.constant 0 : i32
    %c0_i32_2 = arith.constant 0 : i32
    return %c0_i32, %c0_i32_0, %c0_i32_1 : i32, i32, i32
  }
  func.func @transform_2(%arg0: i32) -> (i32, i32) {
    %c0_i32 = arith.constant 0 : i32
    %c0_i32_0 = arith.constant 0 : i32
    %c0_i32_1 = arith.constant 0 : i32
    return %c0_i32, %c0_i32_0 : i32, i32
  }
  func.func @transform_3(%arg0: i32) -> (i32, i32) {
    %c0_i32 = arith.constant 0 : i32
    %c0_i32_0 = arith.constant 0 : i32
    return %c0_i32, %arg0 : i32, i32
  }
}

</mosaic_0001>

<bundles_post_ra>
// kernel: jamba_forward.1
= control target key start
LH: loop header
LB: loop body
LE: loop exit
PB: predicated region body
PF: predicated region fallthrough
CT: control target
= control target key end

     0   :  { %8 = vsyncpa [#allocation3], 0  ;;  %s528_s12 = smov [#allocation2]   ;;  %s620_s0 = inlined_call_operand.vmem [shape: bf16[16,32], index: 0, kind: input, shape index: {}]   ;;  %s621_s1 = inlined_call_operand.hbm [shape: bf16[4,32,32], index: 1, kind: input, shape index: {}]   ;;  %s622_s2 = inlined_call_operand.vmem [shape: f32[16,32], index: 2, kind: input, shape index: {}]   ;;  %s623_s3 = inlined_call_operand.vmem [shape: f32[2,16], index: 3, kind: output, shape index: {}]  }
   0x1   :  { %s16_s13 = sshll.u32 %s528_s12, 4  ;;  %s504_s16 = scalar_lea.hbm %s621_s1, 1024  ;;  %s17_s13 = int_to_ptr.vmem [resolvable:$true] %s16_s13 }
   0x2   :  { %p505_p0 = scmp.ne.s32.totalorder %s621_s1, %s504_s16  ;;  %p508_p1 = scmp.lt.u32.totalorder %s504_s16, %s621_s1 }
   0x4   :  { %p510_p2 = pnand %p508_p1, %p505_p0 }
   0x6   :  { %513 = shalt.err (!%p510_p2)
}
   0x7   :  { %s514_s21 = scalar_lea.vmem %s17_s13, 1024  ;;  %p519_p4 = scmp.lt.s32.totalorder %s17_s13, %s17_s13 }
   0x8   :  { %p515_p3 = scmp.ne.s32.totalorder %s17_s13, %s514_s21  ;;  %p520_p5 = scmp.lt.s32.totalorder %s514_s21, %s514_s21 }
   0xa   :  { %p521_p6 = por %p520_p5, %p519_p4 }
   0xc   :  { %p522_p7 = pnand %p521_p6, %p515_p3 }
   0xe   :  { %525 = shalt.err (!%p522_p7)
}
   0xf   :  { %s529_s22 = smov 64   ;;  %s530_s23 = smov 4  }
  0x10   :  { %22 = dma.hbm_to_vmem [thread:$0]  %s621_s1, 1024, %s17_s13, [#allocation3], %s529_s22, %s529_s22, %s530_s23  }
  0x11   :  { %526 = dma.done.wait [#allocation3], 1024  }
  0x12   :  { %527 = vsyncadd [#allocation3], 4294966272  ;;  %v531_v0 = vmov 0.0   ;;  %vm532_vm0 = vmmov 0   ;;  %v487_v1 = vld [vmem:[#allocation2] sm:$0xff]   ;;  %v488_v2 = vld [vmem:[#allocation2 + $0x8] sm:$0xff]  }
  0x13   :  { %449 = vmatprep.subr.bf16.mxu0 %v531_v0  ;;  %453 = vmatprep.mubr.msk.bf16.mxu0 %vm532_vm0, %v531_v0  ;;  %v489_v3 = vld [vmem:[%s620_s0] sm:$0xff]   ;;  %vm57_vm1 = vcmask 261120   ;;  %v490_v17 = vld [vmem:[#allocation2 + $0x10] sm:$0xff]   ;;  %v491_v18 = vld [vmem:[#allocation2 + $0x18] sm:$0xff]   ;;  %vm409_vm2 = vcmask 123904  }
  0x14   :  { %457 = vmatprep.subr.bf16.mxu1 %v531_v0  ;;  %461 = vmatprep.mubr.msk.bf16.mxu1 %vm532_vm0, %v531_v0  ;;  %v416_v4 = vld [vmem:[%s622_s2] ss:$0 sm:$0xff]  ;;  %v421_v35 = vld [vmem:[%s622_s2 + $0x1] ss:$0 sm:$0xff]  ;;  %v422_v40 = vld [vmem:[%s622_s2 + $0x2] ss:$0 sm:$0xff] }
  0x15   :  { %450 = vmatpush3.bf16.msra.mxu0 %v487_v1  ;;  %458 = vmatpush3.bf16.msra.mxu1 %v490_v17  ;;  %v423_v48 = vld [vmem:[%s622_s2 + $0x3] ss:$0 sm:$0xff]  ;;  %v493_v62 = vld [vmem:[#allocation2 + $0x28] sm:$0xff]  }
  0x16   :  { %451 = vmatprep.subr.bf16.mxu0 %v531_v0  ;;  %459 = vmatprep.subr.bf16.mxu1 %v531_v0  ;;  %v492_v61 = vld [vmem:[#allocation2 + $0x20] sm:$0xff]  }
  0x19   :  { %452 = vmatpush3.bf16.msra.mxu0 %v488_v2  ;;  %460 = vmatpush3.bf16.msra.mxu1 %v491_v18 }
  0x1a   :  { %465 = vmatprep.subr.bf16.mxu0 %v531_v0 }
  0x1c   :  { %454 = vmatmul.mubr.msk.bf16.vlgmr.msra.gmra.mrb[0].mxu0 %vm57_vm1, %v489_v3 }
  0x1d   :  { %469 = vmatprep.mubr.msk.bf16.mxu0 %vm532_vm0, %v531_v0  ;;  %466 = vmatpush3.bf16.msra.mxu0 %v492_v61 }
  0x1e   :  { %467 = vmatprep.subr.bf16.mxu0 %v531_v0  ;;  %v427_v0 = vld [vmem:[%s622_s2 + $0x4] ss:$0 sm:$0xff] }
  0x21   :  { %468 = vmatpush3.bf16.msra.mxu0 %v493_v62 }
  0xef   :  { %v95_v5 = vpop.f32.mrb[0].mxu0 }
  0xf0   :  { %v96_v6 = vadd.f32 %v416_v4, %v95_v5  ;;  %v455_v7 = vpop.f32.mrb[1].mxu0 }
  0xf1   :  { %v98_v8 = vpop.f32.mrb[2].mxu0 }
  0xf2   :  { %v99_v9 = vadd.f32 %v416_v4, %v98_v8  ;;  %v456_v10 = vpop.f32.mrb[3].mxu0  ;;  %v104_v11 = vsel %vm57_vm1, %v96_v6, 0.0  ;;  %v113_v12 = vmul.f32 %v96_v6, %v96_v6 }
  0xf3   :  { %105 = vadd.xlane.f32.xlu0 %v104_v11 }
  0xf4   :  { %v115_v13 = vsel %vm57_vm1, %v113_v12, 0.0  ;;  %v114_v14 = vmul.f32 %v99_v9, %v99_v9  ;;  %v107_v15 = vsel %vm57_vm1, %v99_v9, 0.0 }
  0xf5   :  { %116 = vadd.xlane.f32.xlu1 %v115_v13 }
  0xf6   :  { %v118_v16 = vsel %vm57_vm1, %v114_v14, 0.0 }
  0xf7   :  { %108 = vadd.xlane.f32.xlu0 %v107_v15 }
  0xf9   :  { %119 = vadd.xlane.f32.xlu1 %v118_v16 }
 0x180   :  { %v106_v19 = vpop.xlane.xlu0 %105 }
 0x181   :  { %v111_v20 = vmul.f32 0.03125, %v106_v19  ;;  %v428_v19 = vld [vmem:[%s622_s2 + $0x5] ss:$0 sm:$0xff] }
 0x182   :  { %v117_v21 = vpop.xlane.xlu1 %116 }
 0x183   :  { %v123_v22 = vmul.f32 %v111_v20, %v111_v20  ;;  %v121_v23 = vmul.f32 0.03125, %v117_v21  ;;  %v127_v33 = vsub.f32 %v96_v6, %v111_v20 }
 0x184   :  { %v109_v24 = vpop.xlane.xlu0 %108 }
 0x185   :  { %v125_v25 = vsub.f32 %v121_v23, %v123_v22  ;;  %v112_v26 = vmul.f32 0.03125, %v109_v24 }
 0x186   :  { %v120_v27 = vpop.xlane.xlu1 %119 }
 0x187   :  { %v129_v28 = vadd.f32 1e-05, %v125_v25  ;;  %v124_v29 = vmul.f32 %v112_v26, %v112_v26  ;;  %v122_v30 = vmul.f32 0.03125, %v120_v27  ;;  %v128_v37 = vsub.f32 %v99_v9, %v112_v26 }
 0x189   :  { %496 = vrsqrt.f32 %v129_v28  ;;  %v126_v31 = vsub.f32 %v122_v30, %v124_v29  ;;  %v494_v28 = vld [vmem:[#allocation2 + $0x30] sm:$0xff]   ;;  %v402_v29 = vld [vmem:[%s622_s2 + $0x8] sm:$0x3]  ;;  %v533_v30 = vmov 0  }
 0x18a   :  { %486 = vset.pattern.permute.xlu0 %v533_v30 }
 0x18b   :  { %v130_v32 = vadd.f32 1e-05, %v126_v31  ;;  %v429_v31 = vld [vmem:[%s622_s2 + $0x6] ss:$0 sm:$0xff] }
 0x18d   :  { %498 = vrsqrt.f32 %v130_v32 }
 0x193   :  { %v497_v34 = vpop.eup %496 }
 0x194   :  { %v133_v36 = vmul.f32 %v497_v34, %v127_v33 }
 0x196   :  { %v139_v38 = vmul.f32 %v421_v35, %v133_v36 }
 0x197   :  { %v499_v39 = vpop.eup %498 }
 0x198   :  { %v134_v41 = vmul.f32 %v499_v39, %v128_v37  ;;  %v145_v43 = vadd.f32 %v422_v40, %v139_v38 }
 0x19a   :  { %v140_v42 = vmul.f32 %v421_v35, %v134_v41  ;;  %v147_v45 = vmax.f32 %v145_v43, 0.0 }
 0x19c   :  { %v146_v44 = vadd.f32 %v422_v40, %v140_v42  ;;  %v495_v42 = vld [vmem:[#allocation2 + $0x38] sm:$0xff]  }
 0x19e   :  { %v148_v46 = vmax.f32 %v146_v44, 0.0 }
 0x1a0   :  { %v149_v47 = vpack.c.bf16 %v148_v46, %v147_v45 }
 0x1a2   :  { %462 = vmatmul.mubr.msk.bf16.vlgmr.msra.gmra.mrb[0].mxu1 %vm57_vm1, %v149_v47 }
 0x1a3   :  { %475 = vmatprep.mubr.msk.bf16.mxu1 %vm57_vm1, %v494_v28 }
 0x275   :  { %v209_v49 = vpop.f32.mrb[0].mxu1 }
 0x276   :  { %v210_v50 = vadd.f32 %v423_v48, %v209_v49  ;;  %v463_v51 = vpop.f32.mrb[1].mxu1 }
 0x277   :  { %v212_v52 = vpop.f32.mrb[2].mxu1 }
 0x278   :  { %v213_v53 = vadd.f32 %v423_v48, %v212_v52  ;;  %v464_v54 = vpop.f32.mrb[3].mxu1  ;;  %v218_v55 = vsel %vm57_vm1, %v210_v50, 0.0  ;;  %v226_v56 = vmul.f32 %v210_v50, %v210_v50 }
 0x279   :  { %219 = vadd.xlane.f32.xlu0 %v218_v55 }
 0x27a   :  { %v221_v57 = vsel %vm57_vm1, %v213_v53, 0.0  ;;  %v227_v58 = vmul.f32 %v213_v53, %v213_v53  ;;  %v228_v59 = vsel %vm57_vm1, %v226_v56, 0.0 }
 0x27b   :  { %222 = vadd.xlane.f32.xlu1 %v221_v57 }
 0x27c   :  { %v231_v60 = vsel %vm57_vm1, %v227_v58, 0.0 }
 0x27d   :  { %229 = vadd.xlane.f32.xlu0 %v228_v59 }
 0x27f   :  { %232 = vadd.xlane.f32.xlu1 %v231_v60 }
 0x293   :  { %405 = vperm.xlu0 %486, %v402_v29  }
 0x306   :  { %v220_v63 = vpop.xlane.xlu0 %219 }
 0x307   :  { %v224_v1 = vmul.f32 0.03125, %v220_v63 }
 0x308   :  { %v223_v2 = vpop.xlane.xlu1 %222 }
 0x309   :  { %v225_v3 = vmul.f32 0.03125, %v223_v2  ;;  %v236_v5 = vmul.f32 %v224_v1, %v224_v1  ;;  %v240_v14 = vsub.f32 %v210_v50, %v224_v1 }
 0x30a   :  { %v230_v4 = vpop.xlane.xlu0 %229 }
 0x30b   :  { %v234_v6 = vmul.f32 0.03125, %v230_v4  ;;  %v237_v8 = vmul.f32 %v225_v3, %v225_v3  ;;  %v241_v16 = vsub.f32 %v213_v53, %v225_v3 }
 0x30c   :  { %v233_v7 = vpop.xlane.xlu1 %232 }
 0x30d   :  { %v238_v9 = vsub.f32 %v234_v6, %v236_v5  ;;  %v235_v10 = vmul.f32 0.03125, %v233_v7 }
 0x30f   :  { %v242_v11 = vadd.f32 1e-05, %v238_v9  ;;  %v239_v12 = vsub.f32 %v235_v10, %v237_v8 }
 0x311   :  { %500 = vrsqrt.f32 %v242_v11  ;;  %v243_v13 = vadd.f32 1e-05, %v239_v12 }
 0x312   :  { %v406_v43 = vpop.permute.xlu0 %405 }
 0x313   :  { %502 = vrsqrt.f32 %v243_v13 }
 0x31b   :  { %v501_v15 = vpop.eup %500 }
 0x31c   :  { %v246_v17 = vmul.f32 %v501_v15, %v240_v14 }
 0x31d   :  { %v503_v18 = vpop.eup %502 }
 0x31e   :  { %v247_v20 = vmul.f32 %v503_v18, %v241_v16  ;;  %v252_v21 = vmul.f32 %v427_v0, %v246_v17 }
 0x320   :  { %v253_v22 = vmul.f32 %v427_v0, %v247_v20  ;;  %v258_v23 = vadd.f32 %v428_v19, %v252_v21 }
 0x322   :  { %v259_v24 = vadd.f32 %v428_v19, %v253_v22  ;;  %v260_v25 = vmax.f32 %v258_v23, 0.0 }
 0x324   :  { %v261_v26 = vmax.f32 %v259_v24, 0.0 }
 0x326   :  { %v262_v27 = vpack.c.bf16 %v261_v26, %v260_v25 }
 0x328   :  { %470 = vmatmul.mubr.msk.bf16.vlgmr.msra.gmra.mrb[4].mxu0 %vm57_vm1, %v262_v27 }
 0x3fb   :  { %v322_v32 = vpop.f32.mrb[4].mxu0 }
 0x3fc   :  { %v323_v33 = vadd.f32 %v429_v31, %v322_v32  ;;  %v471_v34 = vpop.f32.mrb[5].mxu0 }
 0x3fd   :  { %v325_v35 = vpop.f32.mrb[6].mxu0 }
 0x3fe   :  { %v326_v36 = vadd.f32 %v429_v31, %v325_v35  ;;  %v472_v37 = vpop.f32.mrb[7].mxu0  ;;  %v329_v38 = vmax.f32 %v323_v33, 0.0 }
 0x400   :  { %v330_v39 = vmax.f32 %v326_v36, 0.0 }
 0x402   :  { %v336_v40 = vpack.c.bf16 %v330_v39, %v329_v38 }
 0x404   :  { %479 = vmatprep.subr.msk.bf16.mxu1 %vm57_vm1, %v336_v40  ;;  %v354_v41 = vsel %vm57_vm1, %v336_v40, 0 }
 0x405   :  { %474 = vmatpush3.bf16.xpose.msra.mxu1 %v354_v41 }
 0x40c   :  { %476 = vmatmul.mubr.msk.bf16.vlgmr.msra.gmra.mrb[4].mxu1 %vm57_vm1, %v495_v42 }
 0x4df   :  { %v477_v44 = vpop.f32.mrb[4].mxu1 }
 0x4e0   :  { %v390_v45 = vpop.f32.mrb[5].mxu1 }
 0x4e1   :  { %v408_v46 = vadd.f32 %v406_v43, %v390_v45  ;;  %v478_v47 = vpop.f32.mrb[6].mxu1 }
 0x4e2   :  { %v393_v48 = vpop.f32.mrb[7].mxu1 }
 0x4e3   :  { %410 = vst.msk [vmem:[%s623_s3] sm:$0x3] %vm409_vm2, %v408_v46 }
 0x4e4   :  { %415 = vsyncpa [#allocation3], 1 }

</bundles_post_ra>
